<compile_context>
chip_gen: v5e
topology: v5e:2x2
jax: 0.10.0
libtpu: 0.0.40
codegen_flags: <defaults>
</compile_context>

<pallas_src>
import functools

import jax
import jax.numpy as jnp
from jax.experimental import pallas as pl
from jax.experimental.pallas import tpu as pltpu


def _round_up(x, m):
    return ((x + m - 1) // m) * m


# ----------------------------- kernel ---------------------------------------


def _qnet_kernel(x_ref, w1_ref, b1_ref, w2_ref, b2_ref, w3_ref, b3_ref, q_ref):
    """Q^T = W3 @ relu(W2 @ relu(W1 @ x + b1) + b2) + b3  (feature-major)."""
    x = x_ref[...]                                                # [S,  TB]
    h = jnp.maximum(
        jnp.dot(w1_ref[...], x, preferred_element_type=jnp.float32)
        + b1_ref[...], 0.0)                                       # [H1, TB]
    h = jnp.maximum(
        jnp.dot(w2_ref[...], h, preferred_element_type=jnp.float32)
        + b2_ref[...], 0.0)                                       # [H2, TB]
    q = jnp.dot(w3_ref[...], h, preferred_element_type=jnp.float32) \
        + b3_ref[...]                                             # [A,  TB]
    q_ref[...] = q.astype(q_ref.dtype)


# ----------------------------- weight prep (one-time, cached) ---------------


def prepare_params(params, dueling):
    """One-time weight fusion + transpose to feature-major. Call ONCE and cache.

    Returns (W1T [H1,S], b1 [H1,1], W2T [H2,H1], b2 [H2,1], W3T [A,H2], b3 [A,1]).
    For dueling, H2 = 2*fc2 and the advantage-mean subtraction is folded into
    W3/b3 (exact: the mean is linear; only f32 reassociation differs).
    """
    if not dueling:
        w1, b1, w2, b2, w3, b3 = params
        return (w1.T, b1.reshape(-1, 1), w2.T, b2.reshape(-1, 1),
                w3.T, b3.reshape(-1, 1))

    w1, b1, wv, bv, wa, ba, wval, bval, wadv, badv = params
    A = wval.shape[1]
    M = jnp.eye(A, dtype=w1.dtype) - 1.0 / A          # I_A - ones(A,A)/A
    w2 = jnp.concatenate([wv, wa], axis=1)            # [fc1, 2*fc2]
    b2 = jnp.concatenate([bv, ba], axis=1)            # [1,   2*fc2]
    w3 = jnp.concatenate([wval, wadv @ M], axis=0)    # [2*fc2, A]
    b3 = bval + badv @ M                              # [1, A]
    return (w1.T, b1.reshape(-1, 1), w2.T, b2.reshape(-1, 1),
            w3.T, b3.reshape(-1, 1))


# ----------------------------- forward --------------------------------------


def _choose_batch_tile(B, block_batch):
    # Batch is on the lane axis -> tile must be a multiple of 128.
    tb = max(128, _round_up(min(block_batch, _round_up(B, 128)), 128))
    # v7x megacore: keep >= 2 grid steps when the batch allows it so the
    # "parallel" axis actually feeds both TensorCores (no-op on v5e/v6e).
    if B > 128 and _round_up(B, tb) // tb < 2:
        tb = _round_up(pl.cdiv(B, 2), 128)
    return tb


@functools.partial(jax.jit, static_argnames=("block_batch",))
def qnetwork_forward(state, prepared, *, block_batch=2048):
    """state: [B, state_size] f32; prepared: output of prepare_params()."""
    w1t, b1, w2t, b2, w3t, b3 = prepared
    B, S = state.shape
    A = w3t.shape[0]

    tb = _choose_batch_tile(B, block_batch)
    b_pad = _round_up(B, tb)

    # Feature-major activation slab; the pad fuses into the same XLA relayout.
    xT = state.T                                      # [S, B]
    if b_pad != B:
        xT = jnp.pad(xT, ((0, 0), (0, b_pad - B)))

    def resident(shape):
        # Full-block, constant block index across the batch grid -> DMA'd once
        # and kept VMEM-resident for the whole loop.
        return pl.BlockSpec(shape, lambda i: (0,) * len(shape))

    qT = pl.pallas_call(
        _qnet_kernel,
        out_shape=jax.ShapeDtypeStruct((A, b_pad), jnp.float32),
        grid=(b_pad // tb,),
        in_specs=[pl.BlockSpec((S, tb), lambda i: (0, i)),
                  resident(w1t.shape), resident(b1.shape),
                  resident(w2t.shape), resident(b2.shape),
                  resident(w3t.shape), resident(b3.shape)],
        out_specs=pl.BlockSpec((A, tb), lambda i: (0, i)),
        compiler_params=pltpu.CompilerParams(
            dimension_semantics=("parallel",)),
    )(xT, w1t, b1, w2t, b2, w3t, b3)

    return qT[:, :B].T                                # back to [B, A]


# ----------------------------- param init ----------------------------------


def _linear_init(key, fan_in, fan_out):
    """Mimic torch nn.Linear default init: U(-1/sqrt(fan_in), 1/sqrt(fan_in))."""
    kw, kb = jax.random.split(key)
    bound = 1.0 / jnp.sqrt(jnp.float32(fan_in))
    w = jax.random.uniform(kw, (fan_in, fan_out), jnp.float32, -bound, bound)
    b = jax.random.uniform(kb, (1, fan_out), jnp.float32, -bound, bound)
    return w, b


def make_params(key, state_size, action_size, dueling, fc1_units=64,
                fc2_units=64):
    if not dueling:
        k1, k2, k3 = jax.random.split(key, 3)
        w1, b1 = _linear_init(k1, state_size, fc1_units)
        w2, b2 = _linear_init(k2, fc1_units, fc2_units)
        w3, b3 = _linear_init(k3, fc2_units, action_size)
        return (w1, b1, w2, b2, w3, b3)
    else:
        k1, k2, k3, k4, k5 = jax.random.split(key, 5)
        w1, b1 = _linear_init(k1, state_size, fc1_units)
        wv, bv = _linear_init(k2, fc1_units, fc2_units)
        wa, ba = _linear_init(k3, fc1_units, fc2_units)
        wval, bval = _linear_init(k4, fc2_units, action_size)
        wadv, badv = _linear_init(k5, fc2_units, action_size)
        return (w1, b1, wv, bv, wa, ba, wval, bval, wadv, badv)


# ----------------------------- reference -----------------------------------


def qnetwork_reference(state, params, dueling):
    if not dueling:
        w1, b1, w2, b2, w3, b3 = params
        x = jax.nn.relu(state @ w1 + b1)
        x = jax.nn.relu(x @ w2 + b2)
        return x @ w3 + b3
    else:
        w1, b1, wv, bv, wa, ba, wval, bval, wadv, badv = params
        y = jax.nn.relu(state @ w1 + b1)
        value = jax.nn.relu(y @ wv + bv)
        adv = jax.nn.relu(y @ wa + ba)
        value = value @ wval + bval
        adv = adv @ wadv + badv
        adv_avg = jnp.mean(adv, axis=1, keepdims=True)
        return value + adv - adv_avg


# ----------------------------- main -----------------------------------------


if __name__ == "__main__":
    key = jax.random.PRNGKey(0)
    k_s1, k_s2, k_s3, k_plain, k_duel = jax.random.split(key, 5)

    state_size = 8
    action_size = 4

    # Batches exercising: tiny acting batch (single tile), a batch that
    # triggers the >=2-grid-step split, and a multi-tile batch with padding.
    states = (
        (jax.random.normal(k_s1, (2, state_size), jnp.float32), 2048),
        (jax.random.normal(k_s2, (200, state_size), jnp.float32), 2048),
        (jax.random.normal(k_s3, (300, state_size), jnp.float32), 128),
    )

    ok = True
    for dueling, pkey in ((False, k_plain), (True, k_duel)):
        params = make_params(pkey, state_size, action_size, dueling)
        prepared = prepare_params(params, dueling)   # one-time fusion (cached)

        for st, bb in states:
            q = jax.block_until_ready(
                qnetwork_forward(st, prepared, block_batch=bb))
            q_ref = qnetwork_reference(st, params, dueling)
            if q.shape != q_ref.shape or not jnp.allclose(
                    q, q_ref, atol=1e-4, rtol=1e-4):
                ok = False

    if ok:
        print("KERNEL_OK")
</pallas_src>

<mosaic_0001>
module attributes {stable_mosaic.version = 11 : i64} {
  func.func @_qnet_kernel(%arg0: i32, %arg1: memref<8x128xf32, #tpu.memory_space<vmem>>, %arg2: memref<64x8xf32, #tpu.memory_space<vmem>>, %arg3: memref<64x1xf32, #tpu.memory_space<vmem>>, %arg4: memref<64x64xf32, #tpu.memory_space<vmem>>, %arg5: memref<64x1xf32, #tpu.memory_space<vmem>>, %arg6: memref<4x64xf32, #tpu.memory_space<vmem>>, %arg7: memref<4x1xf32, #tpu.memory_space<vmem>>, %arg8: memref<4x128xf32, #tpu.memory_space<vmem>>) attributes {dimension_semantics = [#tpu.dimension_semantics<parallel>], iteration_bounds = array<i64: 1>, scalar_prefetch = 0 : i64, scratch_operands = 0 : i64, tpu.core_type = #tpu.core_type<tc>, window_params = [{transform_indices = @transform_0, window_bounds = array<i64: 8, 128>}, {pipeline_mode = #tpu.pipeline_mode<synchronous>, transform_indices = @transform_1, window_bounds = array<i64: 64, 8>}, {pipeline_mode = #tpu.pipeline_mode<synchronous>, transform_indices = @transform_2, window_bounds = array<i64: 64, 1>}, {pipeline_mode = #tpu.pipeline_mode<synchronous>, transform_indices = @transform_3, window_bounds = array<i64: 64, 64>}, {pipeline_mode = #tpu.pipeline_mode<synchronous>, transform_indices = @transform_4, window_bounds = array<i64: 64, 1>}, {pipeline_mode = #tpu.pipeline_mode<synchronous>, transform_indices = @transform_5, window_bounds = array<i64: 4, 64>}, {pipeline_mode = #tpu.pipeline_mode<synchronous>, transform_indices = @transform_6, window_bounds = array<i64: 4, 1>}, {transform_indices = @transform_7, window_bounds = array<i64: 4, 128>}]} {
    %c0 = arith.constant 0 : index
    %c0_0 = arith.constant 0 : index
    %0 = vector.load %arg1[%c0, %c0_0] : memref<8x128xf32, #tpu.memory_space<vmem>>, vector<8x128xf32>
    %c0_1 = arith.constant 0 : index
    %c0_2 = arith.constant 0 : index
    %1 = vector.load %arg2[%c0_1, %c0_2] : memref<64x8xf32, #tpu.memory_space<vmem>>, vector<64x8xf32>
    %cst = arith.constant dense<0.000000e+00> : vector<64x128xf32>
    %2 = tpu.matmul %1, %0, %cst {dimension_numbers = #tpu.dot_dimension_numbers<[1], [0], [0], [1], [0, 0, 1, 1], [], []>} : vector<64x8xf32>, vector<8x128xf32>, vector<64x128xf32> -> vector<64x128xf32>
    %c0_3 = arith.constant 0 : index
    %c0_4 = arith.constant 0 : index
    %3 = vector.load %arg3[%c0_3, %c0_4] : memref<64x1xf32, #tpu.memory_space<vmem>>, vector<64x1xf32>
    %4 = vector.broadcast %3 : vector<64x1xf32> to vector<64x128xf32>
    %5 = arith.addf %2, %4 : vector<64x128xf32>
    %cst_5 = arith.constant 0.000000e+00 : f32
    %6 = vector.broadcast %cst_5 : f32 to vector<64x128xf32>
    %7 = arith.maximumf %5, %6 : vector<64x128xf32>
    %c0_6 = arith.constant 0 : index
    %c0_7 = arith.constant 0 : index
    %8 = vector.load %arg4[%c0_6, %c0_7] : memref<64x64xf32, #tpu.memory_space<vmem>>, vector<64x64xf32>
    %cst_8 = arith.constant dense<0.000000e+00> : vector<64x128xf32>
    %9 = tpu.matmul %8, %7, %cst_8 {dimension_numbers = #tpu.dot_dimension_numbers<[1], [0], [0], [1], [0, 0, 1, 1], [], []>} : vector<64x64xf32>, vector<64x128xf32>, vector<64x128xf32> -> vector<64x128xf32>
    %c0_9 = arith.constant 0 : index
    %c0_10 = arith.constant 0 : index
    %10 = vector.load %arg5[%c0_9, %c0_10] : memref<64x1xf32, #tpu.memory_space<vmem>>, vector<64x1xf32>
    %11 = vector.broadcast %10 : vector<64x1xf32> to vector<64x128xf32>
    %12 = arith.addf %9, %11 : vector<64x128xf32>
    %cst_11 = arith.constant 0.000000e+00 : f32
    %13 = vector.broadcast %cst_11 : f32 to vector<64x128xf32>
    %14 = arith.maximumf %12, %13 : vector<64x128xf32>
    %c0_12 = arith.constant 0 : index
    %c0_13 = arith.constant 0 : index
    %15 = vector.load %arg6[%c0_12, %c0_13] : memref<4x64xf32, #tpu.memory_space<vmem>>, vector<4x64xf32>
    %cst_14 = arith.constant dense<0.000000e+00> : vector<4x128xf32>
    %16 = tpu.matmul %15, %14, %cst_14 {dimension_numbers = #tpu.dot_dimension_numbers<[1], [0], [0], [1], [0, 0, 1, 1], [], []>} : vector<4x64xf32>, vector<64x128xf32>, vector<4x128xf32> -> vector<4x128xf32>
    %c0_15 = arith.constant 0 : index
    %c0_16 = arith.constant 0 : index
    %17 = vector.load %arg7[%c0_15, %c0_16] : memref<4x1xf32, #tpu.memory_space<vmem>>, vector<4x1xf32>
    %18 = vector.broadcast %17 : vector<4x1xf32> to vector<4x128xf32>
    %19 = arith.addf %16, %18 : vector<4x128xf32>
    %c0_17 = arith.constant 0 : index
    %c0_18 = arith.constant 0 : index
    %20 = vector.load %arg8[%c0_17, %c0_18] : memref<4x128xf32, #tpu.memory_space<vmem>>, vector<4x128xf32>
    tpu.vector_store %arg8[%c0_17, %c0_18], %19 {strides = array<i32>} : memref<4x128xf32, #tpu.memory_space<vmem>>, vector<4x128xf32>,
    return
  }
  func.func @transform_0(%arg0: i32) -> (i32, i32) {
    %c0_i32 = arith.constant 0 : i32
    %c0_i32_0 = arith.constant 0 : i32
    return %c0_i32, %arg0 : i32, i32
  }
  func.func @transform_1(%arg0: i32) -> (i32, i32) {
    %c0_i32 = arith.constant 0 : i32
    %c0_i32_0 = arith.constant 0 : i32
    %c0_i32_1 = arith.constant 0 : i32
    return %c0_i32, %c0_i32_0 : i32, i32
  }
  func.func @transform_2(%arg0: i32) -> (i32, i32) {
    %c0_i32 = arith.constant 0 : i32
    %c0_i32_0 = arith.constant 0 : i32
    %c0_i32_1 = arith.constant 0 : i32
    return %c0_i32, %c0_i32_0 : i32, i32
  }
  func.func @transform_3(%arg0: i32) -> (i32, i32) {
    %c0_i32 = arith.constant 0 : i32
    %c0_i32_0 = arith.constant 0 : i32
    %c0_i32_1 = arith.constant 0 : i32
    return %c0_i32, %c0_i32_0 : i32, i32
  }
  func.func @transform_4(%arg0: i32) -> (i32, i32) {
    %c0_i32 = arith.constant 0 : i32
    %c0_i32_0 = arith.constant 0 : i32
    %c0_i32_1 = arith.constant 0 : i32
    return %c0_i32, %c0_i32_0 : i32, i32
  }
  func.func @transform_5(%arg0: i32) -> (i32, i32) {
    %c0_i32 = arith.constant 0 : i32
    %c0_i32_0 = arith.constant 0 : i32
    %c0_i32_1 = arith.constant 0 : i32
    return %c0_i32, %c0_i32_0 : i32, i32
  }
  func.func @transform_6(%arg0: i32) -> (i32, i32) {
    %c0_i32 = arith.constant 0 : i32
    %c0_i32_0 = arith.constant 0 : i32
    %c0_i32_1 = arith.constant 0 : i32
    return %c0_i32, %c0_i32_0 : i32, i32
  }
  func.func @transform_7(%arg0: i32) -> (i32, i32) {
    %c0_i32 = arith.constant 0 : i32
    %c0_i32_0 = arith.constant 0 : i32
    return %c0_i32, %arg0 : i32, i32
  }
}

</mosaic_0001>

<bundles_post_ra>
// kernel: qnetwork_forward.1
= control target key start
LH: loop header
LB: loop body
LE: loop exit
PB: predicated region body
PF: predicated region fallthrough
CT: control target
= control target key end

     0   :  { %vm83_vm0 = vcmask 64512   ;;  %v352_v0 = vmov 0   ;;  %vm213_vm1 = vcmask 523264   ;;  %s518_s2 = inlined_call_operand.vmem [shape: f32[64,1], index: 2, kind: input, shape index: {}]   ;;  %s519_s0 = inlined_call_operand.vmem [shape: f32[8,128], index: 0, kind: input, shape index: {}]   ;;  %s520_s1 = inlined_call_operand.vmem [shape: f32[64,8], index: 1, kind: input, shape index: {}]   ;;  %s521_s4 = inlined_call_operand.vmem [shape: f32[64,1], index: 4, kind: input, shape index: {}]   ;;  %s522_s6 = inlined_call_operand.vmem [shape: f32[4,1], index: 6, kind: input, shape index: {}]   ;;  %s523_s3 = inlined_call_operand.vmem [shape: f32[64,64], index: 3, kind: input, shape index: {}]   ;;  %s524_s5 = inlined_call_operand.vmem [shape: f32[4,64], index: 5, kind: input, shape index: {}]   ;;  %s525_s7 = inlined_call_operand.vmem [shape: f32[4,128], index: 7, kind: output, shape index: {}]  }
   0x1   :  { %350 = vset.pattern.permute.xlu1 %v352_v0  ;;  %v40_v1 = vld [vmem:[%s518_s2 + $0x28] sm:$0xff]  ;;  %v26_v2 = vld [vmem:[%s519_s0] sm:$0xff]  ;;  %349 = vset.pattern.permute.xlu0 %v352_v0  ;;  %v42_v4 = vld [vmem:[%s518_s2 + $0x38] sm:$0xff] }
   0x2   :  { %v27_v3 = vld [vmem:[%s520_s1] sm:$0xff]  ;;  %70 = vperm.xlu1 %350, %v40_v1   ;;  %123 = vmatpush.msra.mxu0 %v26_v2  ;;  %v33_v5 = vld [vmem:[%s520_s1 + $0x30] sm:$0xff]  ;;  %v28_v7 = vld [vmem:[%s520_s1 + $0x8] sm:$0xff] }
   0x3   :  { %322 = vmatmul.msk.f32.vlgmr.msra.gmra.mxu0 %vm83_vm0, %v27_v3  ;;  %80 = vperm.xlu0 %349, %v42_v4   ;;  %v39_v6 = vld [vmem:[%s518_s2 + $0x20] sm:$0xff]  ;;  %v41_v8 = vld [vmem:[%s518_s2 + $0x30] sm:$0xff]  ;;  %v34_v9 = vld [vmem:[%s520_s1 + $0x38] sm:$0xff] }
   0x4   :  { %339 = vmatpush.msra.mxu2 %v26_v2  ;;  %351 = vset.pattern.permute.xlu2 %v352_v0  ;;  %v38_v10 = vld [vmem:[%s518_s2 + $0x18] sm:$0xff]  ;;  %v35_v11 = vld [vmem:[%s518_s2] sm:$0xff]  ;;  %v29_v12 = vld [vmem:[%s520_s1 + $0x10] sm:$0xff] }
   0x5   :  { %328 = vmatmul.msk.f32.vlgmr.msra.gmra.mxu2 %vm83_vm0, %v33_v5  ;;  %60 = vperm.xlu2 %351, %v38_v10   ;;  %v36_v13 = vld [vmem:[%s518_s2 + $0x8] sm:$0xff]  ;;  %v37_v14 = vld [vmem:[%s518_s2 + $0x10] sm:$0xff]  ;;  %v30_v16 = vld [vmem:[%s520_s1 + $0x18] sm:$0xff] }
   0x6   :  { %v170_v15 = vld [vmem:[%s521_s4 + $0x28] sm:$0xff]  ;;  %v171_v17 = vld [vmem:[%s521_s4 + $0x30] sm:$0xff]  ;;  %v172_v18 = vld [vmem:[%s521_s4 + $0x38] sm:$0xff] }
   0x7   :  { %v167_v19 = vld [vmem:[%s521_s4 + $0x10] sm:$0xff]  ;;  %v31_v20 = vld [vmem:[%s520_s1 + $0x20] sm:$0xff]  ;;  %v168_v21 = vld [vmem:[%s521_s4 + $0x18] sm:$0xff] }
   0x8   :  { %v169_v22 = vld [vmem:[%s521_s4 + $0x20] sm:$0xff]  ;;  %v32_v24 = vld [vmem:[%s520_s1 + $0x28] sm:$0xff]  ;;  %v159_v63 = vld [vmem:[%s523_s3 + $0x10] sm:$0xff] }
   0x9   :  { %v288_v23 = vld [vmem:[%s522_s6] sm:$0xf]  ;;  %v166_v26 = vld [vmem:[%s521_s4 + $0x8] sm:$0xff]  ;;  %v163_v0 = vld [vmem:[%s523_s3 + $0x30] sm:$0xff] }
   0xa   :  { %65 = vperm.xlu1 %350, %v39_v6   ;;  %v165_v25 = vld [vmem:[%s521_s4] sm:$0xff]  ;;  %v158_v61 = vld [vmem:[%s523_s3 + $0x8] sm:$0xff]  ;;  %v160_v1 = vld [vmem:[%s523_s3 + $0x18] sm:$0xff] }
   0xb   :  { %323 = vmatmul.msk.f32.gmra.mxu0 %vm83_vm0, %v28_v7  ;;  %75 = vperm.xlu0 %349, %v41_v8   ;;  %v157_v59 = vld [vmem:[%s523_s3] sm:$0xff]  ;;  %v162_v62 = vld [vmem:[%s523_s3 + $0x28] sm:$0xff]  ;;  %v164_v2 = vld [vmem:[%s523_s3 + $0x38] sm:$0xff] }
   0xc   :  { %v161_v60 = vld [vmem:[%s523_s3 + $0x20] sm:$0xff] }
   0xd   :  { %329 = vmatmul.msk.f32.gmra.mxu2 %vm83_vm0, %v34_v9  ;;  %55 = vperm.xlu2 %351, %v37_v14  }
  0x12   :  { %45 = vperm.xlu1 %350, %v35_v11  }
  0x13   :  { %324 = vmatmul.msk.f32.gmra.mxu0 %vm83_vm0, %v29_v12  ;;  %50 = vperm.xlu0 %349, %v36_v13  }
  0x15   :  { %210 = vperm.xlu2 %351, %v172_v18  }
  0x1a   :  { %200 = vperm.xlu1 %350, %v170_v15  }
  0x1b   :  { %325 = vmatmul.msk.f32.gmra.mxu0 %vm83_vm0, %v30_v16  ;;  %205 = vperm.xlu0 %349, %v171_v17  }
  0x1d   :  { %195 = vperm.xlu2 %351, %v169_v22  }
  0x22   :  { %185 = vperm.xlu1 %350, %v167_v19  }
  0x23   :  { %326 = vmatmul.msk.f32.gmra.mxu0 %vm83_vm0, %v31_v20  ;;  %190 = vperm.xlu0 %349, %v168_v21  }
  0x25   :  { %180 = vperm.xlu2 %351, %v166_v26  }
  0x2a   :  { %291 = vperm.xlu1 %350, %v288_v23  }
  0x2b   :  { %327 = vmatmul.msk.f32.gmra.mxu0 %vm83_vm0, %v32_v24  ;;  %175 = vperm.xlu0 %349, %v165_v25  }
  0x5f   :  { %v61_v41 = vpop.permute.xlu2 %60 }
  0x67   :  { %v56_v48 = vpop.permute.xlu2 %55 }
  0x6f   :  { %v211_v7 = vpop.permute.xlu2 %210 }
  0x74   :  { %v71_v39 = vpop.permute.xlu1 %70 }
  0x75   :  { %v81_v28 = vpop.permute.xlu0 %80 }
  0x77   :  { %v196_v12 = vpop.permute.xlu2 %195 }
  0x7c   :  { %v66_v42 = vpop.permute.xlu1 %65 }
  0x7d   :  { %v76_v31 = vpop.permute.xlu0 %75 }
  0x80   :  { %v125_v27 = vpop.f32.mrf.mxu0 }
  0x84   :  { %v46_v51 = vpop.permute.xlu1 %45 }
  0x85   :  { %v51_v52 = vpop.permute.xlu0 %50  ;;  %v126_v55 = vadd.f32 %v125_v27, %v46_v51  ;;  %v181_v27 = vpop.permute.xlu2 %180 }
  0x87   :  { %v149_v58 = vmax.f32 %v126_v55, 0.0 }
  0x88   :  { %v128_v29 = vpop.f32.mrf.mxu0  ;;  %v143_v30 = vpop.f32.mrf.mxu2 }
  0x89   :  { %v144_v32 = vadd.f32 %v143_v30, %v76_v31  ;;  %v129_v53 = vadd.f32 %v128_v29, %v51_v52 }
  0x8b   :  { %v155_v36 = vmax.f32 %v144_v32, 0.0  ;;  %v150_v57 = vmax.f32 %v129_v53, 0.0 }
  0x8c   :  { %v201_v11 = vpop.permute.xlu1 %200 }
  0x8d   :  { %v206_v8 = vpop.permute.xlu0 %205 }
  0x90   :  { %v131_v33 = vpop.f32.mrf.mxu0  ;;  %v146_v34 = vpop.f32.mrf.mxu2 }
  0x91   :  { %v147_v35 = vadd.f32 %v146_v34, %v81_v28  ;;  %v132_v49 = vadd.f32 %v131_v33, %v56_v48 }
  0x93   :  { %v156_v37 = vmax.f32 %v147_v35, 0.0  ;;  %v151_v56 = vmax.f32 %v132_v49, 0.0  ;;  %v287_v35 = vld [vmem:[%s524_s5] sm:$0xf] }
  0x94   :  { %v186_v24 = vpop.permute.xlu1 %185 }
  0x95   :  { %246 = vmatpush.msra.mxu1 %v156_v37  ;;  %340 = vmatpush.msra.mxu3 %v156_v37  ;;  %v191_v16 = vpop.permute.xlu0 %190 }
  0x97   :  { %247 = vmatpush.msra.mxu1 %v155_v36  ;;  %341 = vmatpush.msra.mxu3 %v155_v36 }
  0x98   :  { %v134_v38 = vpop.f32.mrf.mxu0 }
  0x99   :  { %v135_v46 = vadd.f32 %v134_v38, %v61_v41 }
  0x9b   :  { %v152_v54 = vmax.f32 %v135_v46, 0.0 }
  0x9c   :  { %v292_v36 = vpop.permute.xlu1 %291 }
  0x9d   :  { %v176_v30 = vpop.permute.xlu0 %175 }
  0xa0   :  { %v137_v40 = vpop.f32.mrf.mxu0 }
  0xa1   :  { %v138_v44 = vadd.f32 %v137_v40, %v66_v42 }
  0xa3   :  { %v153_v50 = vmax.f32 %v138_v44, 0.0 }
  0xa8   :  { %v140_v43 = vpop.f32.mrf.mxu0 }
  0xa9   :  { %v141_v45 = vadd.f32 %v140_v43, %v71_v39 }
  0xab   :  { %v154_v47 = vmax.f32 %v141_v45, 0.0 }
  0xad   :  { %248 = vmatpush.msra.mxu1 %v154_v47  ;;  %342 = vmatpush.msra.mxu3 %v154_v47 }
  0xaf   :  { %249 = vmatpush.msra.mxu1 %v153_v50  ;;  %343 = vmatpush.msra.mxu3 %v153_v50 }
  0xb1   :  { %250 = vmatpush.msra.mxu1 %v152_v54  ;;  %344 = vmatpush.msra.mxu3 %v152_v54 }
  0xb3   :  { %251 = vmatpush.msra.mxu1 %v151_v56  ;;  %345 = vmatpush.msra.mxu3 %v151_v56 }
  0xb5   :  { %252 = vmatpush.msra.mxu1 %v150_v57  ;;  %346 = vmatpush.msra.mxu3 %v150_v57 }
  0xb7   :  { %253 = vmatpush.msra.mxu1 %v149_v58  ;;  %347 = vmatpush.msra.mxu3 %v149_v58 }
  0xb8   :  { %330 = vmatmul.msk.f32.vlgmr.msra.gmra.mxu1 %vm213_vm1, %v157_v59  ;;  %334 = vmatmul.msk.f32.vlgmr.msra.gmra.mxu3 %vm213_vm1, %v161_v60 }
  0xc0   :  { %331 = vmatmul.msk.f32.gmra.mxu1 %vm213_vm1, %v158_v61  ;;  %335 = vmatmul.msk.f32.gmra.mxu3 %vm213_vm1, %v162_v62 }
  0xc8   :  { %332 = vmatmul.msk.f32.gmra.mxu1 %vm213_vm1, %v159_v63  ;;  %336 = vmatmul.msk.f32.gmra.mxu3 %vm213_vm1, %v163_v0 }
  0xd0   :  { %333 = vmatmul.msk.f32.gmra.mxu1 %vm213_vm1, %v160_v1  ;;  %337 = vmatmul.msk.f32.gmra.mxu3 %vm213_vm1, %v164_v2 }
 0x135   :  { %v255_v3 = vpop.f32.mrf.mxu1 }
 0x136   :  { %v256_v31 = vadd.f32 %v255_v3, %v176_v30 }
 0x138   :  { %v279_v34 = vmax.f32 %v256_v31, 0.0 }
 0x13b   :  { %v267_v4 = vpop.f32.mrf.mxu3 }
 0x13c   :  { %v268_v20 = vadd.f32 %v267_v4, %v196_v12 }
 0x13d   :  { %v258_v5 = vpop.f32.mrf.mxu1 }
 0x13e   :  { %v283_v25 = vmax.f32 %v268_v20, 0.0  ;;  %v259_v28 = vadd.f32 %v258_v5, %v181_v27 }
 0x140   :  { %v280_v33 = vmax.f32 %v259_v28, 0.0 }
 0x143   :  { %v270_v6 = vpop.f32.mrf.mxu3 }
 0x144   :  { %v271_v17 = vadd.f32 %v270_v6, %v201_v11 }
 0x145   :  { %v261_v10 = vpop.f32.mrf.mxu1 }
 0x146   :  { %v284_v22 = vmax.f32 %v271_v17, 0.0  ;;  %v262_v26 = vadd.f32 %v261_v10, %v186_v24 }
 0x148   :  { %v281_v32 = vmax.f32 %v262_v26, 0.0 }
 0x14b   :  { %v273_v9 = vpop.f32.mrf.mxu3 }
 0x14c   :  { %v274_v14 = vadd.f32 %v273_v9, %v206_v8 }
 0x14d   :  { %v264_v19 = vpop.f32.mrf.mxu1 }
 0x14e   :  { %v285_v21 = vmax.f32 %v274_v14, 0.0  ;;  %v265_v23 = vadd.f32 %v264_v19, %v191_v16 }
 0x150   :  { %v282_v29 = vmax.f32 %v265_v23, 0.0 }
 0x153   :  { %v276_v13 = vpop.f32.mrf.mxu3 }
 0x154   :  { %v277_v15 = vadd.f32 %v276_v13, %v211_v7 }
 0x156   :  { %v286_v18 = vmax.f32 %v277_v15, 0.0 }
 0x158   :  { %305 = vmatpush.msrb.mxu2 %v286_v18 }
 0x15a   :  { %306 = vmatpush.msrb.mxu2 %v285_v21 }
 0x15c   :  { %307 = vmatpush.msrb.mxu2 %v284_v22 }
 0x15e   :  { %308 = vmatpush.msrb.mxu2 %v283_v25 }
 0x160   :  { %309 = vmatpush.msrb.mxu2 %v282_v29 }
 0x162   :  { %310 = vmatpush.msrb.mxu2 %v281_v32 }
 0x164   :  { %311 = vmatpush.msrb.mxu2 %v280_v33 }
 0x166   :  { %312 = vmatpush.msrb.mxu2 %v279_v34 }
 0x167   :  { %338 = vmatmul.msk.f32.vlgmr.msrb.gmra.mxu2 %vm213_vm1, %v287_v35 }
 0x1ea   :  { %v314_v37 = vpop.f32.mrf.mxu2 }
 0x1eb   :  { %v315_v38 = vadd.f32 %v314_v37, %v292_v36 }
 0x1ed   :  { %317 = vst [vmem:[%s525_s7] sm:$0xf] %v315_v38 }

</bundles_post_ra>
